<compile_context>
chip_gen: v7x
topology: tpu7x:2x2x1
jax: 0.10.0
libtpu: 0.0.40
codegen_flags: <defaults>
</compile_context>

<pallas_src>
import functools

import jax
import jax.numpy as jnp
from jax.experimental import pallas as pl
from jax.experimental.pallas import tpu as pltpu


def _round_up(n, m):
    return (n + m - 1) // m * m


def _linear_2d_kernel(x_ref, w1_ref, w2t_ref, c_ref, o_ref, *, l2_first):
    # x_ref:   (TB, F1_in_p, F2_in_p)
    # w1_ref:  (F1_out_p, F1_in_p)
    # w2t_ref: (F2_in_p, F2_out_p)
    # c_ref:   (F1_out_p, F2_out_p) f32  (= b1[:,None]*W2.sum(1) + b2, pre-folded)
    # o_ref:   (TB, F1_out_p, F2_out_p)
    tb, f1i, _ = x_ref.shape
    _, f1o, _ = o_ref.shape

    w1 = w1_ref[...]
    w2t = w2t_ref[...]
    c = c_ref[...]
    cdt = w2t.dtype  # compute dtype (bf16 MXU path when inputs are bf16)

    if l2_first:
        # Stage 1 (linear_2): one big MXU matmul over all TB*F1_in rows.
        # (TB, F1_in_p, F2_in_p) -> (TB*F1_in_p, F2_in_p) is a free,
        # sublane-aligned reshape (F1_in_p % 8 == 0).
        x2d = x_ref[...].reshape(tb * f1i, x_ref.shape[2])
        z = jnp.dot(x2d, w2t, preferred_element_type=jnp.float32).astype(cdt)
        # Stage 2 (linear_1): small per-sample matmuls + f32 bias epilogue.
        for b in range(tb):
            zb = z[b * f1i:(b + 1) * f1i, :]
            ob = jnp.dot(w1, zb, preferred_element_type=jnp.float32) + c
            o_ref[b] = ob.astype(o_ref.dtype)
    else:
        # Stage 1 (linear_1): small per-sample matmuls along the F1 axis.
        y1 = [jnp.dot(w1, x_ref[b], preferred_element_type=jnp.float32).astype(cdt)
              for b in range(tb)]
        y1 = jnp.concatenate(y1, axis=0) if tb > 1 else y1[0]
        # Stage 2 (linear_2): one big MXU matmul over TB*F1_out rows + epilogue.
        out = jnp.dot(y1, w2t, preferred_element_type=jnp.float32)
        for b in range(tb):
            o_ref[b] = (out[b * f1o:(b + 1) * f1o, :] + c).astype(o_ref.dtype)


def linear_2d(x, w1, b1, w2, b2, *, batch_tile=8,
              vmem_budget_bytes=40 * 1024 * 1024):
    """Forward of Linear_2D.  x: (B, F1_in, F2_in) -> (B, F1_out, F2_out)."""
    B, f1_in, f2_in = x.shape
    f1_out = w1.shape[0]
    f2_out = w2.shape[0]
    dtype = x.dtype
    itemsize = jnp.dtype(dtype).itemsize

    # ---- one-time wrapper prep (hoisted out of the kernel) ----
    w2t = jnp.swapaxes(w2, 0, 1).astype(dtype)                  # (F2_in, F2_out)
    c = (b1.astype(jnp.float32)[:, None]
         * jnp.sum(w2.astype(jnp.float32), axis=1)[None, :]
         + b2.astype(jnp.float32)[None, :])                     # (F1_out, F2_out) f32
    w1 = w1.astype(dtype)

    # Pick the FLOP-cheaper matmul order (both orders are mathematically exact).
    flops_l2_first = f1_in * f2_out * (f2_in + f1_out)
    flops_l1_first = f1_out * f2_in * (f1_in + f2_out)
    l2_first = bool(flops_l2_first <= flops_l1_first)

    # ---- padding: lane dims -> x128, sublane dims -> x8 ----
    f1_in_p = _round_up(f1_in, 8)      # sublanes of x / lanes (K) of W1
    f2_in_p = _round_up(f2_in, 128)    # lanes of x / sublanes (K) of W2t
    f1_out_p = _round_up(f1_out, 8)    # sublanes of W1 / C / out
    f2_out_p = _round_up(f2_out, 128)  # lanes of W2t / C / out (lane-dense stores)

    # ---- batch tile: biggest that fits the double-buffered VMEM budget ----
    w_bytes = ((f1_out_p * f1_in_p + f2_in_p * f2_out_p) * itemsize
               + f1_out_p * f2_out_p * 4)
    per_b = ((f1_in_p * f2_in_p + f1_out_p * f2_out_p) * itemsize
             + max(f1_in_p, f1_out_p) * max(f2_in_p, f2_out_p) * 4)  # f32 interm.
    tb = max(1, min(batch_tile, B))
    while tb > 1 and 2 * (tb * per_b + w_bytes) > vmem_budget_bytes:
        tb -= 1
    b_p = _round_up(B, tb)

    x_p = x
    if (b_p, f1_in_p, f2_in_p) != (B, f1_in, f2_in):
        x_p = jnp.pad(x, ((0, b_p - B), (0, f1_in_p - f1_in), (0, f2_in_p - f2_in)))
    w1_p = jnp.pad(w1, ((0, f1_out_p - f1_out), (0, f1_in_p - f1_in)))
    w2t_p = jnp.pad(w2t, ((0, f2_in_p - f2_in), (0, f2_out_p - f2_out)))
    c_p = jnp.pad(c, ((0, f1_out_p - f1_out), (0, f2_out_p - f2_out)))

    kernel = functools.partial(_linear_2d_kernel, l2_first=l2_first)

    out_p = pl.pallas_call(
        kernel,
        out_shape=jax.ShapeDtypeStruct((b_p, f1_out_p, f2_out_p), dtype),
        grid_spec=pltpu.PrefetchScalarGridSpec(
            num_scalar_prefetch=0,
            grid=(b_p // tb,),
            in_specs=[
                pl.BlockSpec((tb, f1_in_p, f2_in_p), lambda i: (i, 0, 0)),
                # constant index maps -> weights / folded bias stay VMEM-resident
                pl.BlockSpec((f1_out_p, f1_in_p), lambda i: (0, 0)),
                pl.BlockSpec((f2_in_p, f2_out_p), lambda i: (0, 0)),
                pl.BlockSpec((f1_out_p, f2_out_p), lambda i: (0, 0)),
            ],
            out_specs=pl.BlockSpec((tb, f1_out_p, f2_out_p), lambda i: (i, 0, 0)),
        ),
        compiler_params=pltpu.CompilerParams(
            dimension_semantics=("parallel",),
            vmem_limit_bytes=64 * 1024 * 1024,
        ),
    )(x_p, w1_p, w2t_p, c_p)

    if (b_p, f1_out_p, f2_out_p) != (B, f1_out, f2_out):
        out_p = out_p[:B, :f1_out, :f2_out]
    return out_p


def _reference(x, w1, b1, w2, b2):
    # Pure-JAX replica of the PyTorch forward.
    y = jnp.transpose(x, (0, 2, 1))                 # (B, F2_in, F1_in)
    y = jnp.einsum("bfi,oi->bfo", y, w1) + b1       # (B, F2_in, F1_out)
    y = jnp.transpose(y, (0, 2, 1))                 # (B, F1_out, F2_in)
    y = jnp.einsum("bfi,oi->bfo", y, w2) + b2       # (B, F1_out, F2_out)
    return y


def _run_case(key, B, f1_in, f2_in, f1_out, f2_out):
    kx, kw1, kb1, kw2, kb2 = jax.random.split(key, 5)
    x = jax.random.normal(kx, (B, f1_in, f2_in), dtype=jnp.float32)
    # nn.Linear parameter shapes: weight (out, in), bias (out,)
    w1 = jax.random.normal(kw1, (f1_out, f1_in), dtype=jnp.float32) * 0.1
    b1 = jax.random.normal(kb1, (f1_out,), dtype=jnp.float32) * 0.1
    w2 = jax.random.normal(kw2, (f2_out, f2_in), dtype=jnp.float32) * 0.1
    b2 = jax.random.normal(kb2, (f2_out,), dtype=jnp.float32) * 0.1

    out = jax.block_until_ready(linear_2d(x, w1, b1, w2, b2))
    ref = _reference(x, w1, b1, w2, b2)

    assert out.shape == (B, f1_out, f2_out)
    err = float(jnp.max(jnp.abs(out - ref)))
    assert jnp.allclose(out, ref, atol=1e-4, rtol=1e-4), err


if __name__ == "__main__":
    key = jax.random.PRNGKey(0)
    k1, k2 = jax.random.split(key)

    # Case 1: exercises the linear_2-first (big-matmul-first) order.
    _run_case(k1, B=2, f1_in=16, f2_in=32, f1_out=24, f2_out=48)
    # Case 2: exercises the linear_1-first order (asymmetric features).
    _run_case(k2, B=3, f1_in=48, f2_in=16, f1_out=8, f2_out=40)

    print("KERNEL_OK")
</pallas_src>

<mosaic_0001>
module attributes {stable_mosaic.version = 11 : i64} {
  func.func @_linear_2d_kernel(%arg0: i32, %arg1: memref<2x16x128xf32, #tpu.memory_space<vmem>>, %arg2: memref<24x16xf32, #tpu.memory_space<vmem>>, %arg3: memref<128x128xf32, #tpu.memory_space<vmem>>, %arg4: memref<24x128xf32, #tpu.memory_space<vmem>>, %arg5: memref<2x24x128xf32, #tpu.memory_space<vmem>>) attributes {dimension_semantics = [#tpu.dimension_semantics<parallel>], iteration_bounds = array<i64: 1>, scalar_prefetch = 0 : i64, scratch_operands = 0 : i64, tpu.core_type = #tpu.core_type<tc>, window_params = [{transform_indices = @transform_0, window_bounds = array<i64: 2, 16, 128>}, {pipeline_mode = #tpu.pipeline_mode<synchronous>, transform_indices = @transform_1, window_bounds = array<i64: 24, 16>}, {pipeline_mode = #tpu.pipeline_mode<synchronous>, transform_indices = @transform_2, window_bounds = array<i64: 128, 128>}, {pipeline_mode = #tpu.pipeline_mode<synchronous>, transform_indices = @transform_3, window_bounds = array<i64: 24, 128>}, {transform_indices = @transform_4, window_bounds = array<i64: 2, 24, 128>}]} {
    %c0 = arith.constant 0 : index
    %c0_0 = arith.constant 0 : index
    %0 = vector.load %arg2[%c0, %c0_0] : memref<24x16xf32, #tpu.memory_space<vmem>>, vector<24x16xf32>
    %c0_1 = arith.constant 0 : index
    %c0_2 = arith.constant 0 : index
    %1 = vector.load %arg3[%c0_1, %c0_2] : memref<128x128xf32, #tpu.memory_space<vmem>>, vector<128x128xf32>
    %c0_3 = arith.constant 0 : index
    %c0_4 = arith.constant 0 : index
    %2 = vector.load %arg4[%c0_3, %c0_4] : memref<24x128xf32, #tpu.memory_space<vmem>>, vector<24x128xf32>
    %c0_5 = arith.constant 0 : index
    %c0_6 = arith.constant 0 : index
    %c0_7 = arith.constant 0 : index
    %3 = vector.load %arg1[%c0_5, %c0_6, %c0_7] : memref<2x16x128xf32, #tpu.memory_space<vmem>>, vector<2x16x128xf32>
    %4 = vector.shape_cast %3 : vector<2x16x128xf32> to vector<32x128xf32>
    %cst = arith.constant dense<0.000000e+00> : vector<32x128xf32>
    %5 = tpu.matmul %4, %1, %cst {dimension_numbers = #tpu.dot_dimension_numbers<[1], [0], [0], [1], [0, 0, 1, 1], [], []>} : vector<32x128xf32>, vector<128x128xf32>, vector<32x128xf32> -> vector<32x128xf32>
    %6 = vector.extract_strided_slice %5 {offsets = [0, 0], sizes = [16, 128], strides = [1, 1]} : vector<32x128xf32> to vector<16x128xf32>
    %cst_8 = arith.constant dense<0.000000e+00> : vector<24x128xf32>
    %7 = tpu.matmul %0, %6, %cst_8 {dimension_numbers = #tpu.dot_dimension_numbers<[1], [0], [0], [1], [0, 0, 1, 1], [], []>} : vector<24x16xf32>, vector<16x128xf32>, vector<24x128xf32> -> vector<24x128xf32>
    %8 = arith.addf %7, %2 : vector<24x128xf32>
    %c0_9 = arith.constant 0 : index
    %c0_10 = arith.constant 0 : index
    %c0_11 = arith.constant 0 : index
    %9 = vector.load %arg5[%c0_9, %c0_10, %c0_11] : memref<2x24x128xf32, #tpu.memory_space<vmem>>, vector<1x24x128xf32>
    %10 = vector.shape_cast %9 : vector<1x24x128xf32> to vector<24x128xf32>
    %11 = vector.shape_cast %8 : vector<24x128xf32> to vector<1x24x128xf32>
    tpu.vector_store %arg5[%c0_9, %c0_10, %c0_11], %11 {strides = array<i32>} : memref<2x24x128xf32, #tpu.memory_space<vmem>>, vector<1x24x128xf32>,
    %12 = vector.extract_strided_slice %5 {offsets = [16, 0], sizes = [16, 128], strides = [1, 1]} : vector<32x128xf32> to vector<16x128xf32>
    %cst_12 = arith.constant dense<0.000000e+00> : vector<24x128xf32>
    %13 = tpu.matmul %0, %12, %cst_12 {dimension_numbers = #tpu.dot_dimension_numbers<[1], [0], [0], [1], [0, 0, 1, 1], [], []>} : vector<24x16xf32>, vector<16x128xf32>, vector<24x128xf32> -> vector<24x128xf32>
    %14 = arith.addf %13, %2 : vector<24x128xf32>
    %c1 = arith.constant 1 : index
    %c0_13 = arith.constant 0 : index
    %c0_14 = arith.constant 0 : index
    %15 = vector.load %arg5[%c1, %c0_13, %c0_14] : memref<2x24x128xf32, #tpu.memory_space<vmem>>, vector<1x24x128xf32>
    %16 = vector.shape_cast %15 : vector<1x24x128xf32> to vector<24x128xf32>
    %17 = vector.shape_cast %14 : vector<24x128xf32> to vector<1x24x128xf32>
    tpu.vector_store %arg5[%c1, %c0_13, %c0_14], %17 {strides = array<i32>} : memref<2x24x128xf32, #tpu.memory_space<vmem>>, vector<1x24x128xf32>,
    return
  }
  func.func @transform_0(%arg0: i32) -> (i32, i32, i32) {
    %c0_i32 = arith.constant 0 : i32
    %c0_i32_0 = arith.constant 0 : i32
    %c0_i32_1 = arith.constant 0 : i32
    return %arg0, %c0_i32, %c0_i32_0 : i32, i32, i32
  }
  func.func @transform_1(%arg0: i32) -> (i32, i32) {
    %c0_i32 = arith.constant 0 : i32
    %c0_i32_0 = arith.constant 0 : i32
    %c0_i32_1 = arith.constant 0 : i32
    return %c0_i32, %c0_i32_0 : i32, i32
  }
  func.func @transform_2(%arg0: i32) -> (i32, i32) {
    %c0_i32 = arith.constant 0 : i32
    %c0_i32_0 = arith.constant 0 : i32
    %c0_i32_1 = arith.constant 0 : i32
    return %c0_i32, %c0_i32_0 : i32, i32
  }
  func.func @transform_3(%arg0: i32) -> (i32, i32) {
    %c0_i32 = arith.constant 0 : i32
    %c0_i32_0 = arith.constant 0 : i32
    %c0_i32_1 = arith.constant 0 : i32
    return %c0_i32, %c0_i32_0 : i32, i32
  }
  func.func @transform_4(%arg0: i32) -> (i32, i32, i32) {
    %c0_i32 = arith.constant 0 : i32
    %c0_i32_0 = arith.constant 0 : i32
    %c0_i32_1 = arith.constant 0 : i32
    return %arg0, %c0_i32, %c0_i32_0 : i32, i32, i32
  }
}

</mosaic_0001>

<bundles_post_ra>
// kernel: tpu_custom_call.1
= control target key start
LH: loop header
LB: loop body
LE: loop exit
PB: predicated region body
PF: predicated region fallthrough
CT: control target
= control target key end

     0   :  { %9 = vsyncpa [#allocation3], 0  ;;  %s782_s0 = inlined_call_operand.hbm [shape: f32[2,16,128], index: 0, kind: input, shape index: {}]   ;;  %s783_s1 = inlined_call_operand.hbm [shape: f32[24,16], index: 1, kind: input, shape index: {}]   ;;  %s784_s2 = inlined_call_operand.hbm [shape: f32[128,128], index: 2, kind: input, shape index: {}]   ;;  %s785_s3 = inlined_call_operand.hbm [shape: f32[24,128], index: 3, kind: input, shape index: {}]   ;;  %s786_s4 = inlined_call_operand.hbm [shape: f32[2,24,128], index: 4, kind: output, shape index: {}]  }
   0x1   :  { %10 = vsyncpa [#allocation6], 0 }
   0x2   :  { %11 = vsyncpa [#allocation9], 0 }
   0x3   :  { %12 = vsyncpa [#allocation4], 0  ;;  %s646_s15 = smov [#allocation5]   ;;  %s647_s17 = smov [#allocation2]  }
   0x4   :  { %s30_s16 = sshll.u32 %s646_s15, 4  ;;  %s18_s18 = sshll.u32 %s647_s17, 4  ;;  %s31_s16 = int_to_ptr.vmem [resolvable:$true] %s30_s16  ;;  %s681_s18 = int_to_ptr.vmem [resolvable:$true] %s18_s18 }
   0x5   :  { %s528_s21 = scalar_lea.hbm %s783_s1, 384 }
   0x6   :  { %p529_p0 = scmp.ne.s32.totalorder %s783_s1, %s528_s21  ;;  %p532_p1 = scmp.lt.u32.totalorder %s528_s21, %s783_s1 }
   0x8   :  { %p534_p2 = pnand %p532_p1, %p529_p0 }
   0xa   :  { %537 = shalt.err (!%p534_p2)
}
   0xb   :  { %s538_s26 = scalar_lea.vmem %s31_s16, 384  ;;  %p543_p4 = scmp.lt.s32.totalorder %s31_s16, %s31_s16 }
   0xc   :  { %p539_p3 = scmp.ne.s32.totalorder %s31_s16, %s538_s26  ;;  %p544_p5 = scmp.lt.s32.totalorder %s538_s26, %s538_s26 }
   0xe   :  { %p545_p6 = por %p544_p5, %p543_p4 }
  0x10   :  { %p546_p7 = pnand %p545_p6, %p539_p3 }
  0x12   :  { %549 = shalt.err (!%p546_p7)
}
  0x13   :  { %s648_s27 = smov 128   ;;  %s649_s28 = smov 8  }
  0x14   :  { %36 = dma.hbm_to_vmem [thread:$0]  %s783_s1, 384, %s31_s16, [#allocation6], %s648_s27, %s648_s27, %s649_s28  }
  0x15   :  { %s550_s7 = scalar_lea.hbm %s782_s0, 512 }
  0x16   :  { %p551_p8 = scmp.ne.s32.totalorder %s782_s0, %s550_s7  ;;  %p554_p9 = scmp.lt.u32.totalorder %s550_s7, %s782_s0 }
  0x18   :  { %p556_p10 = pnand %p554_p9, %p551_p8 }
  0x1a   :  { %559 = shalt.err (!%p556_p10)
}
  0x1b   :  { %s560_s12 = scalar_lea.vmem %s681_s18, 512  ;;  %p565_p12 = scmp.lt.s32.totalorder %s681_s18, %s681_s18 }
  0x1c   :  { %p561_p11 = scmp.ne.s32.totalorder %s681_s18, %s560_s12  ;;  %p566_p13 = scmp.lt.s32.totalorder %s560_s12, %s560_s12 }
  0x1e   :  { %p567_p0 = por %p566_p13, %p565_p12 }
  0x20   :  { %p568_p1 = pnand %p567_p0, %p561_p11 }
  0x22   :  { %571 = shalt.err (!%p568_p1)
}
  0x23   :  { %24 = dma.hbm_to_vmem [thread:$0]  %s782_s0, 512, %s681_s18, [#allocation3], %s648_s27, %s648_s27, %s649_s28  }
  0x24   :  { %s650_s14 = smov [#allocation7]   ;;  %s651_s16 = smov [#allocation8]  }
  0x25   :  { %s42_s15 = sshll.u32 %s650_s14, 4  ;;  %s54_s17 = sshll.u32 %s651_s16, 4  ;;  %s43_s15 = int_to_ptr.vmem [resolvable:$true] %s42_s15  ;;  %s718_s17 = int_to_ptr.vmem [resolvable:$true] %s54_s17 }
  0x26   :  { %s572_s21 = scalar_lea.hbm %s784_s2, 2048 }
  0x27   :  { %p573_p2 = scmp.ne.s32.totalorder %s784_s2, %s572_s21  ;;  %p576_p3 = scmp.lt.u32.totalorder %s572_s21, %s784_s2 }
  0x29   :  { %p578_p4 = pnand %p576_p3, %p573_p2 }
  0x2b   :  { %581 = shalt.err (!%p578_p4)
}
  0x2c   :  { %s582_s0 = scalar_lea.vmem %s43_s15, 2048  ;;  %p587_p6 = scmp.lt.s32.totalorder %s43_s15, %s43_s15 }
  0x2d   :  { %p583_p5 = scmp.ne.s32.totalorder %s43_s15, %s582_s0  ;;  %p588_p7 = scmp.lt.s32.totalorder %s582_s0, %s582_s0 }
  0x2f   :  { %p589_p8 = por %p588_p7, %p587_p6 }
  0x31   :  { %p590_p9 = pnand %p589_p8, %p583_p5 }
  0x33   :  { %593 = shalt.err (!%p590_p9)
}
  0x34   :  { %48 = dma.hbm_to_vmem [thread:$0]  %s784_s2, 2048, %s43_s15, [#allocation6], %s648_s27, %s648_s27, %s649_s28  }
  0x35   :  { %s594_s5 = scalar_lea.hbm %s785_s3, 384 }
  0x36   :  { %p595_p10 = scmp.ne.s32.totalorder %s785_s3, %s594_s5  ;;  %p598_p11 = scmp.lt.u32.totalorder %s594_s5, %s785_s3 }
  0x38   :  { %p600_p12 = pnand %p598_p11, %p595_p10 }
  0x3a   :  { %603 = shalt.err (!%p600_p12)
}
  0x3b   :  { %s604_s10 = scalar_lea.vmem %s718_s17, 384  ;;  %p609_p0 = scmp.lt.s32.totalorder %s718_s17, %s718_s17 }
  0x3c   :  { %p605_p13 = scmp.ne.s32.totalorder %s718_s17, %s604_s10  ;;  %p610_p1 = scmp.lt.s32.totalorder %s604_s10, %s604_s10 }
  0x3e   :  { %p611_p2 = por %p610_p1, %p609_p0 }
  0x40   :  { %p612_p3 = pnand %p611_p2, %p605_p13 }
  0x42   :  { %615 = shalt.err (!%p612_p3)
}
  0x43   :  { %60 = dma.hbm_to_vmem [thread:$0]  %s785_s3, 384, %s718_s17, [#allocation9], %s648_s27, %s648_s27, %s649_s28  }
  0x44   :  { %638 = dma.done.wait [#allocation3], 512  }
  0x45   :  { %639 = vsyncadd [#allocation3], 4294966784 }
  0x46   :  { %640 = dma.done.wait [#allocation6], 2432  }
  0x47   :  { %641 = vsyncadd [#allocation6], 4294964864 }
  0x48   :  { %642 = dma.done.wait [#allocation9], 384  }
  0x49   :  { %643 = vsyncadd [#allocation9], 4294966912  ;;  %v76_v0 = vld [vmem:[#allocation7] sm:$0xff]  ;;  %v77_v1 = vld [vmem:[#allocation7 + $0x8] sm:$0xff]  ;;  %v652_v28 = vmov 0.0|0.0   ;;  %vm653_vm0 = vmmov 0  }
  0x4a   :  { %v78_v2 = vld [vmem:[#allocation7 + $0x10] sm:$0xff]  ;;  %v480_v3 = vpack.c.bf16 %v77_v1, %v76_v0  ;;  %v79_v4 = vld [vmem:[#allocation7 + $0x18] sm:$0xff]  ;;  %v80_v6 = vld [vmem:[#allocation7 + $0x20] sm:$0xff]  ;;  %512 = vmatprep.subr.bf16.mxu1 %v652_v28  ;;  %v654_v29 = vmov 0.0   ;;  %vm184_vm1 = vcmask 130048   ;;  %s655_s3 = smov [#allocation10]  }
  0x4b   :  { %v484_v5 = vpack.c.bf16 %v79_v4, %v78_v2  ;;  %v81_v7 = vld [vmem:[#allocation7 + $0x28] sm:$0xff]  ;;  %v82_v10 = vld [vmem:[#allocation7 + $0x30] sm:$0xff]  ;;  %v83_v11 = vld [vmem:[#allocation7 + $0x38] sm:$0xff]  ;;  %458 = vmatprep.mubr.msk.f32.mxu1 %vm653_vm0, %v654_v29  ;;  %s366_s12 = sshll.u32 %s655_s3, 4  ;;  %s367_s12 = int_to_ptr.vmem [resolvable:$true] %s366_s12 }
  0x4c   :  { %481 = vmatprep.subr.bf16.mxu0 %v480_v3  ;;  %v488_v8 = vpack.c.bf16 %v81_v7, %v80_v6  ;;  %v95_v9 = vld [vmem:[#allocation2] sm:$0xff]  ;;  %v492_v12 = vpack.c.bf16 %v83_v11, %v82_v10  ;;  %v84_v13 = vld [vmem:[#allocation7 + $0x40] sm:$0xff]  ;;  %v86_v16 = vld [vmem:[#allocation7 + $0x50] sm:$0xff]  ;;  %s616_s1 = scalar_lea.vmem %s367_s12, 768  ;;  %p621_p5 = scmp.lt.s32.totalorder %s367_s12, %s367_s12 }
  0x4d   :  { %483 = vmatpush3.bf16.msra.mxu0 %v480_v3  ;;  %448 = vmatprep.mubr.f32.mxu0 %v95_v9  ;;  %v85_v14 = vld [vmem:[#allocation7 + $0x48] sm:$0xff]  ;;  %v87_v17 = vld [vmem:[#allocation7 + $0x58] sm:$0xff]  ;;  %v88_v19 = vld [vmem:[#allocation7 + $0x60] sm:$0xff]  ;;  %p617_p4 = scmp.ne.s32.totalorder %s367_s12, %s616_s1  ;;  %p622_p6 = scmp.lt.s32.totalorder %s616_s1, %s616_s1 }
  0x4e   :  { %485 = vmatprep.subr.bf16.mxu0 %v484_v5  ;;  %v496_v15 = vpack.c.bf16 %v85_v14, %v84_v13  ;;  %v500_v18 = vpack.c.bf16 %v87_v17, %v86_v16  ;;  %v89_v20 = vld [vmem:[#allocation7 + $0x68] sm:$0xff]  ;;  %v90_v22 = vld [vmem:[#allocation7 + $0x70] sm:$0xff]  ;;  %v91_v23 = vld [vmem:[#allocation7 + $0x78] sm:$0xff] }
  0x4f   :  { %v504_v21 = vpack.c.bf16 %v89_v20, %v88_v19  ;;  %v508_v24 = vpack.c.bf16 %v91_v23, %v90_v22  ;;  %v96_v25 = vld [vmem:[#allocation2 + $0x8] sm:$0xff]  ;;  %v97_v26 = vld [vmem:[#allocation2 + $0x10] sm:$0xff]  ;;  %v98_v27 = vld [vmem:[#allocation2 + $0x18] sm:$0xff]  ;;  %p623_p7 = por %p622_p6, %p621_p5 }
  0x50   :  { %v73_v34 = vld [vmem:[#allocation5] sm:$0xff]  ;;  %v74_v37 = vld [vmem:[#allocation5 + $0x8] sm:$0xff]  ;;  %v75_v38 = vld [vmem:[#allocation5 + $0x10] sm:$0xff] }
  0x51   :  { %487 = vmatpush3.bf16.msra.mxu0 %v484_v5  ;;  %v92_v39 = vld [vmem:[#allocation8] sm:$0xff]  ;;  %v93_v43 = vld [vmem:[#allocation8 + $0x8] sm:$0xff]  ;;  %v94_v47 = vld [vmem:[#allocation8 + $0x10] sm:$0xff]  ;;  %p624_p8 = pnand %p623_p7, %p617_p4 }
  0x52   :  { %489 = vmatprep.subr.bf16.mxu0 %v488_v8 }
  0x55   :  { %491 = vmatpush3.bf16.msra.mxu0 %v488_v8 }
  0x56   :  { %493 = vmatprep.subr.bf16.mxu0 %v492_v12 }
  0x59   :  { %495 = vmatpush3.bf16.msra.mxu0 %v492_v12 }
  0x5a   :  { %497 = vmatprep.subr.bf16.mxu0 %v496_v15 }
  0x5d   :  { %499 = vmatpush3.bf16.msra.mxu0 %v496_v15 }
  0x5e   :  { %501 = vmatprep.subr.bf16.mxu0 %v500_v18 }
  0x61   :  { %503 = vmatpush3.bf16.msra.mxu0 %v500_v18 }
  0x62   :  { %505 = vmatprep.subr.bf16.mxu0 %v504_v21 }
  0x65   :  { %507 = vmatpush3.bf16.msra.mxu0 %v504_v21 }
  0x66   :  { %509 = vmatprep.subr.bf16.mxu0 %v508_v24 }
  0x69   :  { %511 = vmatpush3.bf16.msra.mxu0 %v508_v24 }
  0x6c   :  { %449 = vmatmul.mubr.f32.vlgmr.msra.gmra.mrb[0].mxu0 %v96_v25 }
  0x6d   :  { %451 = vmatprep.mubr.f32.mxu0 %v97_v26 }
  0x70   :  { %452 = vmatmul.mubr.f32.gmra.mrb[2].mxu0 %v98_v27 }
 0x13f   :  { %v450_v30 = vpop.f32.mrb[0].mxu0 }
 0x140   :  { %v165_v31 = vpop.f32.mrb[1].mxu0 }
 0x141   :  { %v513_v32 = vpack.c.bf16 %v450_v30, %v165_v31 }
 0x143   :  { %v453_v33 = vpop.f32.mrb[2].mxu0  ;;  %514 = vmatpush3.bf16.msra.mxu1 %v513_v32 }
 0x144   :  { %v175_v35 = vpop.f32.mrb[3].mxu0  ;;  %515 = vmatprep.subr.bf16.mxu1 %v652_v28 }
 0x145   :  { %v516_v36 = vpack.c.bf16 %v453_v33, %v175_v35 }
 0x146   :  { %459 = vmatmul.mubr.msk.f32.vlgmr.msra.gmra.mrb[0].mxu1 %vm184_vm1, %v73_v34 }
 0x147   :  { %517 = vmatpush3.bf16.msra.mxu1 %v516_v36  ;;  %461 = vmatprep.mubr.msk.f32.mxu1 %vm653_vm0, %v654_v29 }
 0x14a   :  { %462 = vmatmul.mubr.msk.f32.gmra.mrb[2].mxu1 %vm184_vm1, %v74_v37 }
 0x14b   :  { %464 = vmatprep.mubr.msk.f32.mxu1 %vm653_vm0, %v654_v29 }
 0x14e   :  { %465 = vmatmul.mubr.msk.f32.gmra.mrb[4].mxu1 %vm184_vm1, %v75_v38 }
 0x14f   :  { %471 = vmatprep.mubr.msk.f32.mxu1 %vm653_vm0, %v654_v29 }
 0x152   :  { %472 = vmatmul.mubr.msk.f32.vlgmr.msra.gmra.mrb[6].mxu1 %vm184_vm1, %v73_v34 }
 0x153   :  { %474 = vmatprep.mubr.msk.f32.mxu1 %vm653_vm0, %v654_v29 }
 0x156   :  { %475 = vmatmul.mubr.msk.f32.gmra.mrb[8].mxu1 %vm184_vm1, %v74_v37 }
 0x157   :  { %477 = vmatprep.mubr.msk.f32.mxu1 %vm653_vm0, %v654_v29 }
 0x15a   :  { %478 = vmatmul.mubr.msk.f32.gmra.mrb[10].mxu1 %vm184_vm1, %v75_v38 }
 0x219   :  { %v260_v40 = vpop.f32.mrb[0].mxu1 }
 0x21a   :  { %v261_v41 = vadd.f32 %v260_v40, %v92_v39  ;;  %v460_v42 = vpop.f32.mrb[1].mxu1 }
 0x21c   :  { %274 = vst [vmem:[#allocation10] sm:$0xff] %v261_v41 }
 0x21d   :  { %v265_v44 = vpop.f32.mrb[2].mxu1 }
 0x21e   :  { %v266_v45 = vadd.f32 %v265_v44, %v93_v43  ;;  %v463_v46 = vpop.f32.mrb[3].mxu1 }
 0x220   :  { %275 = vst [vmem:[#allocation10 + $0x8] sm:$0xff] %v266_v45 }
 0x221   :  { %v270_v48 = vpop.f32.mrb[4].mxu1 }
 0x222   :  { %v271_v49 = vadd.f32 %v270_v48, %v94_v47  ;;  %v466_v50 = vpop.f32.mrb[5].mxu1 }
 0x224   :  { %276 = vst [vmem:[#allocation10 + $0x10] sm:$0xff] %v271_v49 }
 0x225   :  { %v343_v51 = vpop.f32.mrb[6].mxu1 }
 0x226   :  { %v344_v52 = vadd.f32 %v343_v51, %v92_v39  ;;  %v473_v53 = vpop.f32.mrb[7].mxu1 }
 0x228   :  { %358 = vst [vmem:[#allocation10 + $0x18] sm:$0xff] %v344_v52 }
 0x229   :  { %v348_v54 = vpop.f32.mrb[8].mxu1 }
 0x22a   :  { %v349_v55 = vadd.f32 %v348_v54, %v93_v43  ;;  %v476_v56 = vpop.f32.mrb[9].mxu1 }
 0x22c   :  { %359 = vst [vmem:[#allocation10 + $0x20] sm:$0xff] %v349_v55 }
 0x22d   :  { %v353_v57 = vpop.f32.mrb[10].mxu1 }
 0x22e   :  { %v354_v58 = vadd.f32 %v353_v57, %v94_v47  ;;  %v479_v59 = vpop.f32.mrb[11].mxu1 }
 0x230   :  { %360 = vst [vmem:[#allocation10 + $0x28] sm:$0xff] %v354_v58 }
 0x231   :  { %627 = shalt.err (!%p624_p8)
}
 0x232   :  { %s628_s15 = scalar_lea.hbm %s786_s4, 768 }
 0x233   :  { %p629_p9 = scmp.ne.s32.totalorder %s786_s4, %s628_s15  ;;  %p632_p10 = scmp.lt.u32.totalorder %s628_s15, %s786_s4 }
 0x235   :  { %p634_p11 = pnand %p632_p10, %p629_p9 }
 0x237   :  { %637 = shalt.err (!%p634_p11)
}
 0x238   :  { %372 = dma.vmem_to_hbm [thread:$0]  %s367_s12, 768, %s786_s4, [#allocation4], %s648_s27, %s648_s27, %s649_s28  }
 0x239   :  { %644 = dma.done.wait [#allocation4], 768  }
 0x23a   :  { %645 = vsyncadd [#allocation4], 4294966528 }
 0x23b   :  { %376 = vsyncpa [#allocation3], 1 }
 0x23c   :  { %377 = vsyncpa [#allocation6], 1 }
 0x23d   :  { %378 = vsyncpa [#allocation9], 1 }
 0x23e   :  { %379 = vsyncpa [#allocation4], 1 }

</bundles_post_ra>
